<compile_context>
chip_gen: v7x
topology: tpu7x:2x2x1
jax: 0.10.0
libtpu: 0.0.40
codegen_flags: <defaults>
</compile_context>

<pallas_src>
import functools

import numpy as np
import jax
import jax.numpy as jnp
from jax.experimental import pallas as pl
from jax.experimental.pallas import tpu as pltpu


def attn_kernel(x_ref, g_ref, wx_ref, wg_ref, bias_ref, whx_ref, bhx_ref, out_ref,
                *, seq_len, act_dtype):
    rows, F = x_ref.shape              # rows = tb * seq_len
    H = wx_ref.shape[1]
    tb = rows // seq_len

    x = x_ref[...]                     # (tb*S, F) in the HBM dtype; single live copy

    # ---- projection 1: one tall 2D MXU matmul, low-precision operands, f32 accum ----
    feat = jnp.dot(x.astype(wx_ref.dtype), wx_ref[...],
                   preferred_element_type=jnp.float32)            # (tb*S, H) f32

    # ---- guidance projection; biases (b_x + b_g) were folded once in the wrapper ----
    g_emb = jnp.dot(g_ref[...].astype(wg_ref.dtype), wg_ref[...],
                    preferred_element_type=jnp.float32)           # (tb, H) f32
    g_emb = g_emb + bias_ref[...]

    # S % 8 == 0 -> this reshape is a sublane-aligned view (no VMEM copy).
    pre = feat.reshape(tb, seq_len, H) + g_emb[:, None, :]
    hidden = jnp.tanh(pre.astype(act_dtype))   # bf16 on v6e/v7x doubles EUP throughput
    # (dropout skipped — eval-mode identity)

    # ---- N=1 logits projection on the VPU/XLU: multiply by w_hx row, reduce over H ----
    # Result carried as (tb, S): seq on the lane axis -> lane-dense softmax below.
    # (bf16 hidden * f32 w_hx promotes to f32, so the H-reduction accumulates in f32.)
    logits = jnp.sum(hidden * whx_ref[...], axis=-1) + bhx_ref[0]   # (tb, S) f32

    # ---- softmax over the sequence axis (last axis == lanes) ----
    m = jnp.max(logits, axis=-1, keepdims=True)
    e = jnp.exp(logits - m)
    denom = jnp.sum(e, axis=-1, keepdims=True)
    inv = pl.reciprocal(denom, approx=True)        # EUP slot (free after exp)
    inv = inv * (2.0 - denom * inv)                # one Newton step -> f32 accuracy
    attn = e * inv                                 # (tb, S)

    # ---- output = sum_s a_s * x_s : VPU broadcast-multiply + sublane reduce over S ----
    # TODO(synk): for S >= 256 switch this to a per-batch MXU matmul ('bs,bsf->bf').
    x3 = x.reshape(tb, seq_len, F).astype(jnp.float32)   # free view; cast at point of use
    out = jnp.sum(attn[:, :, None] * x3, axis=1)         # (tb, F) f32
    out_ref[...] = out.astype(out_ref.dtype)


def _tpu_caps():
    """(vmem_capacity_bytes, has_bf16_vpu) with conservative fallbacks."""
    kind = ""
    try:
        kind = jax.devices()[0].device_kind.lower()
    except Exception:
        pass
    has_bf16_vpu = any(tag in kind for tag in ("v6", "v7", "7x"))
    vmem = (64 << 20) if ("v7" in kind or "7x" in kind) else (128 << 20)
    try:
        info = pltpu.get_tpu_info()
        vmem = int(getattr(info, "vmem_capacity_bytes", vmem))
    except Exception:
        pass
    return vmem, has_bf16_vpu


def _pick_batch_tile(B, S, F, G, H, x_itemsize, *, working_set_budget):
    """Batch tile: multiple of 8 (sublane-dense g/out blocks, free X reshape) unless the
    whole batch fits one compliant block. Prefer >= 2 grid steps (v7x has 2 TensorCores
    sharded over the "parallel" axis) and an even number of steps."""
    if B <= 8:
        return B                                    # single full block (block == array dims)

    def working_set(tb):
        return (2 * tb * S * F * x_itemsize         # double-buffered X tile
                + 2 * tb * G * x_itemsize           # double-buffered g tile
                + 2 * tb * F * 4                    # double-buffered output tile
                + 2 * tb * S * H * 4)               # feat / hidden f32 intermediates

    max_tb = max(8, ((B + 1) // 2) // 8 * 8)        # keep >= 2 grid steps
    cands = [tb for tb in range(8, max_tb + 1, 8) if working_set(tb) <= working_set_budget]
    if not cands:
        return 8                                    # smallest compliant tile; caller re-checks VMEM
    best = cands[-1]
    for tb in reversed(cands):                      # prefer an even grid length (megacore balance)
        if tb * 2 < best:
            break
        if pl.cdiv(B, tb) % 2 == 0:
            best = tb
            break
    return best


def attn_forward(X, g, params, *, batch_tile=None, matmul_dtype=jnp.bfloat16,
                 act_dtype=None):
    """X: (B, S, F), g: (B, G) -> (B, F).

    matmul_dtype=bf16 (default) feeds the MXU bf16 operands with f32 accumulation.
    For H <~ 128 the kernel is HBM-bound; shipping X (and reading the output) as bf16
    in HBM is a further near-2x win if the model tolerates it.
    """
    B, S, F = X.shape
    G = g.shape[1]
    assert S % 8 == 0, "input_seq_size must be a multiple of 8 (sublane-aligned views)"
    # TODO(synk): pad S + mask the softmax for non-multiple-of-8 sequence lengths.

    wx, bx, wg, bg, whx, bhx = (params["W_x_w"], params["W_x_b"],
                                params["W_g_w"], params["W_g_b"],
                                params["W_hx_w"], params["W_hx_b"])
    H = wx.shape[0]

    vmem_cap, has_bf16_vpu = _tpu_caps()
    if act_dtype is None:
        low_prec_mm = np.dtype(matmul_dtype) == np.dtype(jnp.bfloat16)
        act_dtype = jnp.bfloat16 if (has_bf16_vpu and low_prec_mm) else jnp.float32

    if vmem_cap <= (64 << 20):                      # v7x-class: 64 MiB VMEM per TC
        ws_budget, vmem_cap_limit = 20 << 20, 48 << 20
    else:                                           # v5e / v6e: 128 MiB VMEM
        ws_budget, vmem_cap_limit = 56 << 20, 100 << 20

    # One-time weight prep (outside the kernel): pre-transposed matmul operands,
    # folded bias row (b_x + b_g), w_hx as an f32 row, b_hx as an SMEM scalar.
    wx_t = jnp.asarray(wx.T, matmul_dtype)                       # (F, H)
    wg_t = jnp.asarray(wg.T, matmul_dtype)                       # (G, H)
    bias_row = (bx + bg).reshape(1, H).astype(jnp.float32)       # (1, H)
    whx_row = whx.reshape(1, H).astype(jnp.float32)              # (1, H)
    bhx1 = bhx.reshape(1).astype(jnp.float32)                    # SMEM scalar

    x_flat = X.reshape(B * S, F)                    # flatten once in the wrapper

    if batch_tile is None:
        batch_tile = _pick_batch_tile(B, S, F, G, H, X.dtype.itemsize,
                                      working_set_budget=ws_budget)
    tb = int(batch_tile)
    assert tb == B or tb % 8 == 0, "batch_tile must be a multiple of 8 (or the full batch)"
    grid = (pl.cdiv(B, tb),)                        # ragged batches OK (masked tail writeback)

    # VMEM budget: pipelined tiles + resident weights + f32 intermediates.
    mm_isize = np.dtype(matmul_dtype).itemsize
    weight_once = (F * H + G * H) * mm_isize + 2 * H * 4
    single_buffer_weights = weight_once >= (1 << 20)   # constant-index blocks: 1 buffer is enough
    weight_bytes = weight_once * (1 if single_buffer_weights else 2)
    need_bytes = (2 * tb * S * F * X.dtype.itemsize
                  + 2 * tb * G * g.dtype.itemsize
                  + 2 * tb * F * X.dtype.itemsize
                  + 2 * tb * S * H * 4
                  + weight_bytes)
    # TODO(synk): add a sequence-tiled grid for very large S*F instead of raising.
    if need_bytes > vmem_cap_limit:
        raise ValueError(f"Attn tile working set ({need_bytes >> 20} MiB) exceeds the "
                         f"VMEM cap ({vmem_cap_limit >> 20} MiB); shrink batch_tile.")
    vmem_limit = int(min(max(2 * need_bytes, 32 << 20), vmem_cap_limit))

    def _resident(shape):
        if single_buffer_weights:
            return pl.BlockSpec(shape, lambda b: (0,) * len(shape),
                                pipeline_mode=pl.Buffered(1))
        return pl.BlockSpec(shape, lambda b: (0,) * len(shape))

    kernel = functools.partial(attn_kernel, seq_len=S, act_dtype=act_dtype)

    out = pl.pallas_call(
        kernel,
        out_shape=jax.ShapeDtypeStruct((B, F), X.dtype),
        grid=grid,
        in_specs=[
            pl.BlockSpec((tb * S, F), lambda b: (b, 0)),    # X rows (flattened batch*seq)
            pl.BlockSpec((tb, G), lambda b: (b, 0)),        # g rows (sublane-dense)
            _resident((F, H)),                              # W_x^T (resident)
            _resident((G, H)),                              # W_g^T (resident)
            _resident((1, H)),                              # folded bias b_x + b_g
            _resident((1, H)),                              # w_hx row
            pl.BlockSpec(memory_space=pltpu.MemorySpace.SMEM),  # b_hx scalar
        ],
        out_specs=pl.BlockSpec((tb, F), lambda b: (b, 0)),  # lane/sublane-dense output
        compiler_params=pltpu.CompilerParams(
            dimension_semantics=("parallel",),
            vmem_limit_bytes=vmem_limit),
    )(x_flat, g, wx_t, wg_t, bias_row, whx_row, bhx1)
    return out


def init_params(key, num_hidden, input_feat_size, guidance_size):
    """Deterministic PyTorch-style (uniform +/- 1/sqrt(fan_in)) init."""
    ks = jax.random.split(key, 6)

    def lin(kw, kb, out_f, in_f):
        bound = 1.0 / jnp.sqrt(jnp.float32(in_f))
        w = jax.random.uniform(kw, (out_f, in_f), jnp.float32, -bound, bound)
        b = jax.random.uniform(kb, (out_f,), jnp.float32, -bound, bound)
        return w, b

    wx, bx = lin(ks[0], ks[1], num_hidden, input_feat_size)
    wg, bg = lin(ks[2], ks[3], num_hidden, guidance_size)
    whx, bhx = lin(ks[4], ks[5], 1, num_hidden)
    return {"W_x_w": wx, "W_x_b": bx,
            "W_g_w": wg, "W_g_b": bg,
            "W_hx_w": whx, "W_hx_b": bhx}


def attn_reference(X, g, params):
    """Plain-JAX reference of the PyTorch forward (eval mode)."""
    feat = jnp.einsum("bsf,hf->bsh", X, params["W_x_w"]) + params["W_x_b"]
    g_emb = g @ params["W_g_w"].T + params["W_g_b"]
    hidden = jnp.tanh(feat + g_emb[:, None, :])
    logits = jnp.einsum("bsh,oh->bso", hidden, params["W_hx_w"]) + params["W_hx_b"]
    attn = jax.nn.softmax(logits, axis=1)
    return jnp.einsum("bs,bsf->bf", attn[..., 0], X)


if __name__ == "__main__":
    B, S, F = 16, 8, 32         # batch, input_seq_size, input_feat_size
    H, G = 32, 16               # num_hidden, guidance_size

    key = jax.random.PRNGKey(0)
    k_x, k_g, k_p, k_x2, k_g2 = jax.random.split(key, 5)
    X = jax.random.normal(k_x, (B, S, F), jnp.float32)
    g = jax.random.normal(k_g, (B, G), jnp.float32)
    params = init_params(k_p, H, F, G)
    ref = attn_reference(X, g, params)

    # Default fast path: bf16 MXU operands (+ bf16 tanh on v6e/v7x), auto tile -> grid=(2,).
    out = jax.block_until_ready(attn_forward(X, g, params))
    assert out.shape == (B, F)
    assert jnp.allclose(out, ref, atol=7.5e-2, rtol=5e-2), "bf16 path mismatch vs reference"

    # Full-f32 path on an explicit 2-step grid: tight correctness check.
    out32 = jax.block_until_ready(
        attn_forward(X, g, params, batch_tile=8,
                     matmul_dtype=jnp.float32, act_dtype=jnp.float32))
    assert jnp.allclose(out32, ref, atol=3e-5, rtol=3e-5), "f32 path mismatch vs reference"

    # Ragged batch (B % tile != 0) exercises the cdiv grid + masked tail writeback.
    Br = 11
    Xr = jax.random.normal(k_x2, (Br, S, F), jnp.float32)
    gr = jax.random.normal(k_g2, (Br, G), jnp.float32)
    outr = jax.block_until_ready(
        attn_forward(Xr, gr, params, matmul_dtype=jnp.float32, act_dtype=jnp.float32))
    refr = attn_reference(Xr, gr, params)
    assert outr.shape == (Br, F)
    assert jnp.allclose(outr, refr, atol=3e-5, rtol=3e-5), "ragged-batch mismatch vs reference"

    print("KERNEL_OK")
</pallas_src>

<mosaic_0001>
module attributes {stable_mosaic.version = 11 : i64} {
  func.func @attn_kernel(%arg0: i32, %arg1: memref<64x32xf32, #tpu.memory_space<vmem>>, %arg2: memref<8x16xf32, #tpu.memory_space<vmem>>, %arg3: memref<32x32xbf16, #tpu.memory_space<vmem>>, %arg4: memref<16x32xbf16, #tpu.memory_space<vmem>>, %arg5: memref<1x32xf32, #tpu.memory_space<vmem>>, %arg6: memref<1x32xf32, #tpu.memory_space<vmem>>, %arg7: memref<1xf32, #tpu.memory_space<smem>>, %arg8: memref<8x32xf32, #tpu.memory_space<vmem>>) attributes {dimension_semantics = [#tpu.dimension_semantics<parallel>], iteration_bounds = array<i64: 2>, scalar_prefetch = 0 : i64, scratch_operands = 0 : i64, tpu.core_type = #tpu.core_type<tc>, window_params = [{transform_indices = @transform_0, window_bounds = array<i64: 64, 32>}, {transform_indices = @transform_1, window_bounds = array<i64: 8, 16>}, {pipeline_mode = #tpu.pipeline_mode<synchronous>, transform_indices = @transform_2, window_bounds = array<i64: 32, 32>}, {pipeline_mode = #tpu.pipeline_mode<synchronous>, transform_indices = @transform_3, window_bounds = array<i64: 16, 32>}, {pipeline_mode = #tpu.pipeline_mode<synchronous>, transform_indices = @transform_4, window_bounds = array<i64: 1, 32>}, {pipeline_mode = #tpu.pipeline_mode<synchronous>, transform_indices = @transform_5, window_bounds = array<i64: 1, 32>}, {transform_indices = @transform_6, window_bounds = array<i64: 1>}, {transform_indices = @transform_7, window_bounds = array<i64: 8, 32>}]} {
    %c0 = arith.constant 0 : index
    %c0_0 = arith.constant 0 : index
    %0 = vector.load %arg1[%c0, %c0_0] : memref<64x32xf32, #tpu.memory_space<vmem>>, vector<64x32xf32>
    %1 = arith.truncf %0 : vector<64x32xf32> to vector<64x32xbf16>
    %c0_1 = arith.constant 0 : index
    %c0_2 = arith.constant 0 : index
    %2 = vector.load %arg3[%c0_1, %c0_2] : memref<32x32xbf16, #tpu.memory_space<vmem>>, vector<32x32xbf16>
    %cst = arith.constant dense<0.000000e+00> : vector<64x32xf32>
    %3 = tpu.matmul %1, %2, %cst {dimension_numbers = #tpu.dot_dimension_numbers<[1], [0], [0], [1], [0, 0, 1, 1], [], []>} : vector<64x32xbf16>, vector<32x32xbf16>, vector<64x32xf32> -> vector<64x32xf32>
    %c0_3 = arith.constant 0 : index
    %c0_4 = arith.constant 0 : index
    %4 = vector.load %arg2[%c0_3, %c0_4] : memref<8x16xf32, #tpu.memory_space<vmem>>, vector<8x16xf32>
    %5 = arith.truncf %4 : vector<8x16xf32> to vector<8x16xbf16>
    %c0_5 = arith.constant 0 : index
    %c0_6 = arith.constant 0 : index
    %6 = vector.load %arg4[%c0_5, %c0_6] : memref<16x32xbf16, #tpu.memory_space<vmem>>, vector<16x32xbf16>
    %cst_7 = arith.constant dense<0.000000e+00> : vector<8x32xf32>
    %7 = tpu.matmul %5, %6, %cst_7 {dimension_numbers = #tpu.dot_dimension_numbers<[1], [0], [0], [1], [0, 0, 1, 1], [], []>} : vector<8x16xbf16>, vector<16x32xbf16>, vector<8x32xf32> -> vector<8x32xf32>
    %c0_8 = arith.constant 0 : index
    %c0_9 = arith.constant 0 : index
    %8 = vector.load %arg5[%c0_8, %c0_9] : memref<1x32xf32, #tpu.memory_space<vmem>>, vector<1x32xf32>
    %9 = vector.broadcast %8 : vector<1x32xf32> to vector<8x32xf32>
    %10 = arith.addf %7, %9 : vector<8x32xf32>
    %11 = vector.shape_cast %3 : vector<64x32xf32> to vector<8x8x32xf32>
    %12 = vector.shape_cast %10 : vector<8x32xf32> to vector<8x1x32xf32>
    %13 = vector.broadcast %12 : vector<8x1x32xf32> to vector<8x8x32xf32>
    %14 = arith.addf %11, %13 : vector<8x8x32xf32>
    %15 = math.tanh %14 : vector<8x8x32xf32>
    %c0_10 = arith.constant 0 : index
    %c0_11 = arith.constant 0 : index
    %16 = vector.load %arg6[%c0_10, %c0_11] : memref<1x32xf32, #tpu.memory_space<vmem>>, vector<1x32xf32>
    %17 = vector.shape_cast %16 : vector<1x32xf32> to vector<1x1x32xf32>
    %18 = vector.broadcast %17 : vector<1x1x32xf32> to vector<8x8x32xf32>
    %19 = arith.mulf %15, %18 : vector<8x8x32xf32>
    %cst_12 = arith.constant dense<0.000000e+00> : vector<8x8xf32>
    %20 = vector.multi_reduction <add>, %19, %cst_12 [2] : vector<8x8x32xf32> to vector<8x8xf32>
    %c0_13 = arith.constant 0 : index
    %21 = memref.load %arg7[%c0_13] : memref<1xf32, #tpu.memory_space<smem>>
    %22 = vector.broadcast %21 : f32 to vector<8x8xf32>
    %23 = arith.addf %20, %22 : vector<8x8xf32>
    %cst_14 = arith.constant dense<0xFF800000> : vector<8xf32>
    %24 = vector.multi_reduction <maximumf>, %23, %cst_14 [1] : vector<8x8xf32> to vector<8xf32>
    %25 = vector.shape_cast %24 : vector<8xf32> to vector<8x1xf32>
    %26 = vector.broadcast %25 : vector<8x1xf32> to vector<8x8xf32>
    %27 = arith.subf %23, %26 : vector<8x8xf32>
    %28 = math.exp %27 : vector<8x8xf32>
    %cst_15 = arith.constant dense<0.000000e+00> : vector<8xf32>
    %29 = vector.multi_reduction <add>, %28, %cst_15 [1] : vector<8x8xf32> to vector<8xf32>
    %30 = vector.shape_cast %29 : vector<8xf32> to vector<8x1xf32>
    %31 = tpu.reciprocal %30 {approx = true} : vector<8x1xf32> -> vector<8x1xf32>
    %32 = arith.mulf %30, %31 : vector<8x1xf32>
    %cst_16 = arith.constant 2.000000e+00 : f32
    %33 = vector.broadcast %cst_16 : f32 to vector<8x1xf32>
    %34 = arith.subf %33, %32 : vector<8x1xf32>
    %35 = arith.mulf %31, %34 : vector<8x1xf32>
    %36 = vector.broadcast %35 : vector<8x1xf32> to vector<8x8xf32>
    %37 = arith.mulf %28, %36 : vector<8x8xf32>
    %38 = vector.shape_cast %0 : vector<64x32xf32> to vector<8x8x32xf32>
    %39 = vector.shape_cast %37 : vector<8x8xf32> to vector<8x8x1xf32>
    %40 = vector.broadcast %39 : vector<8x8x1xf32> to vector<8x8x32xf32>
    %41 = arith.mulf %40, %38 : vector<8x8x32xf32>
    %cst_17 = arith.constant dense<0.000000e+00> : vector<8x32xf32>
    %42 = vector.multi_reduction <add>, %41, %cst_17 [1] : vector<8x8x32xf32> to vector<8x32xf32>
    %c0_18 = arith.constant 0 : index
    %c0_19 = arith.constant 0 : index
    %43 = vector.load %arg8[%c0_18, %c0_19] : memref<8x32xf32, #tpu.memory_space<vmem>>, vector<8x32xf32>
    tpu.vector_store %arg8[%c0_18, %c0_19], %42 {strides = array<i32>} : memref<8x32xf32, #tpu.memory_space<vmem>>, vector<8x32xf32>,
    return
  }
  func.func @transform_0(%arg0: i32) -> (i32, i32) {
    %c0_i32 = arith.constant 0 : i32
    %c0_i32_0 = arith.constant 0 : i32
    return %arg0, %c0_i32 : i32, i32
  }
  func.func @transform_1(%arg0: i32) -> (i32, i32) {
    %c0_i32 = arith.constant 0 : i32
    %c0_i32_0 = arith.constant 0 : i32
    return %arg0, %c0_i32 : i32, i32
  }
  func.func @transform_2(%arg0: i32) -> (i32, i32) {
    %c0_i32 = arith.constant 0 : i32
    %c0_i32_0 = arith.constant 0 : i32
    %c0_i32_1 = arith.constant 0 : i32
    return %c0_i32, %c0_i32_0 : i32, i32
  }
  func.func @transform_3(%arg0: i32) -> (i32, i32) {
    %c0_i32 = arith.constant 0 : i32
    %c0_i32_0 = arith.constant 0 : i32
    %c0_i32_1 = arith.constant 0 : i32
    return %c0_i32, %c0_i32_0 : i32, i32
  }
  func.func @transform_4(%arg0: i32) -> (i32, i32) {
    %c0_i32 = arith.constant 0 : i32
    %c0_i32_0 = arith.constant 0 : i32
    %c0_i32_1 = arith.constant 0 : i32
    return %c0_i32, %c0_i32_0 : i32, i32
  }
  func.func @transform_5(%arg0: i32) -> (i32, i32) {
    %c0_i32 = arith.constant 0 : i32
    %c0_i32_0 = arith.constant 0 : i32
    %c0_i32_1 = arith.constant 0 : i32
    return %c0_i32, %c0_i32_0 : i32, i32
  }
  func.func @transform_6(%arg0: i32) -> i32 {
    %c0_i32 = arith.constant 0 : i32
    %c0_i32_0 = arith.constant 0 : i32
    return %c0_i32 : i32
  }
  func.func @transform_7(%arg0: i32) -> (i32, i32) {
    %c0_i32 = arith.constant 0 : i32
    %c0_i32_0 = arith.constant 0 : i32
    return %arg0, %c0_i32 : i32, i32
  }
}

</mosaic_0001>

<bundles_post_ra>
// kernel: tpu_custom_call.1
= control target key start
LH: loop header
LB: loop body
LE: loop exit
PB: predicated region body
PF: predicated region fallthrough
CT: control target
= control target key end

     0   :  { %s1593_s0 = inlined_call_operand.vmem [shape: f32[128,32], index: 0, kind: input, shape index: {}]   ;;  %s1594_s1 = inlined_call_operand.vmem [shape: f32[16,16], index: 1, kind: input, shape index: {}]   ;;  %s1595_s2 = inlined_call_operand.vmem [shape: bf16[32,32], index: 2, kind: input, shape index: {}]   ;;  %s1596_s3 = inlined_call_operand.vmem [shape: bf16[16,32], index: 3, kind: input, shape index: {}]   ;;  %s1597_s4 = inlined_call_operand.vmem [shape: f32[1,32], index: 4, kind: input, shape index: {}]   ;;  %s1598_s5 = inlined_call_operand.vmem [shape: f32[1,32], index: 5, kind: input, shape index: {}]   ;;  %s1599_s6 = inlined_call_operand.<no memory space> [shape: f32[1], index: 6, kind: input, shape index: {}]   ;;  %s1600_s7 = inlined_call_operand.hbm [shape: f32[16,32], index: 7, kind: output, shape index: {}]  }
   0x1   :  { %12 = sst [smem:[#allocation2]] %s1599_s6 }
   0x2   :  { %13 = vsyncpa [#allocation4], 0 }
   0x3   :  { %15 = vsyncpa [#allocation4 + $0x1], 0  ;;  %s1322_s26 = smov 0   ;;  %s1324_s27 = smov 0  }
   0x4   :  { %s1326_s28 = smov 0   ;;  %s1328_s29 = smov 0  }
   0x5 LB: > { %s1343_s6 = sadd.s32 4294967295, %s1272_s29   ;;  %s1080_s30 = sadd.s32 4294967294, %s1272_s29   ;;  %s1272_s29 = sphi %s1328_s29, %s1606_s29   ;;  %s1268_s28 = sphi %s1326_s28, %s1605_s28   ;;  %s1264_s27 = sphi %s1324_s27, %s1604_s27   ;;  %s1260_s26 = sphi %s1322_s26, %s1603_s26  }
   0x6   : > { %s1347_s8 = sadd.s32 1, %s1272_s29   ;;  %s185_s9 = sadd.s32 1, %s1268_s28 }
   0x7   : > { %s182_s10 = ssub.s32 %s1272_s29, %s1347_s8  ;;  %p195_p0 = scmp.ne.s32.totalorder %s1268_s28, %s1264_s27 }
   0x8   : > { %p183_p1 = scmp.eq.s32.totalorder %s182_s10, 0  ;;  %p196_p2 = scmp.eq.s32.totalorder %s1343_s6, 1 }
   0x9   : > { %p201_p3 = scmp.ne.s32.totalorder %s1264_s27, %s1260_s26  ;;  %p202_p4 = scmp.eq.s32.totalorder %s1080_s30, 1 }
   0xa   : > { %s1358_s11 = scalar_select %p183_p1, %s1268_s28, %s185_s9  }
   0xb   : > { %p1360_p5 = por %p196_p2, %p195_p0  ;;  %p1364_p6 = por %p202_p4, %p201_p3 }
   0xc   : > { %p1083_p7 = scmp.ge.s32.totalorder %s1272_s29, 1  ;;  %p251_p8 = scmp.lt.s32.totalorder %s1272_s29, 3 }
   0xe   : > { %p252_p9 = pnand %p1083_p7, %p251_p8 }
   0xf   : > { %v1173_v0 = vld [vmem:[%s1595_s2] sm:$0xff] (!%p252_p9)   ;;  %v1274_v1 = vmov (!%p252_p9), 0.0   ;;  %v1175_v3 = vld [vmem:[%s1595_s2 + $0x8] sm:$0xff] (!%p252_p9)   ;;  %vm1275_vm0 = vmmov (!%p252_p9), 0   ;;  %p293_p10 = scmp.lt.s32.totalorder (!%p252_p9), %s1343_s6, 1  ;;  %s1085_s20 = sshll.u32 (!%p252_p9), %s1343_s6, 3  ;;  %v470_v20 = vlaneseq (!%p252_p9) }
  0x10   : > { %255 = sbr.rel (%p252_p9) target bundleno = 1092 (0x444), region = 48  ;;  %1122 = vmatprep.subr.bf16.mxu1 (!%p252_p9), %v1274_v1  ;;  %v1174_v2 = vld [vmem:[%s1596_s3] sm:$0xff] (!%p252_p9)   ;;  %1110 = vmatprep.subr.bf16.mxu0 (!%p252_p9), %v1173_v0  ;;  %p288_p11 = scmp.lt.s32.totalorder (!%p252_p9), %s1085_s20, 15  ;;  %vm421_vm1 = vcmask (!%p252_p9), 130048   ;;  %vm326_vm2 = vcmask (!%p252_p9), 261120   ;;  %vm662_vm3 = vcmask (!%p252_p9), 1041409  }
  0x11   : > { %1124 = vmatprep.mubr.msk.bf16.mxu1 (!%p252_p9), %vm1275_vm0, %v1274_v1  ;;  %1111 = vmatpush3.bf16.msra.mxu0 (!%p252_p9), %v1173_v0  ;;  %v1276_v18 = vmov (!%p252_p9), 1966171168   ;;  %v1417_v22 = vshrl.u32 (!%p252_p9), %v470_v20, 7  ;;  %v1094_v23 = vld [vmem:[%s1597_s4] ss:$0 sm:$0xff] (!%p252_p9)  ;;  %s610_s19 = sld [smem:[#allocation2]] (!%p252_p9) }
  0x12   : > { %1123 = vmatpush3.bf16.msra.mxu1 (!%p252_p9), %v1174_v2  ;;  %1112 = vmatprep.subr.bf16.mxu0 (!%p252_p9), %v1175_v3  ;;  %v468_v19 = vunpack.c.l.s4 (!%p252_p9), %v1276_v18  ;;  %vm664_vm4 = vcmask (!%p252_p9), 1042434   ;;  %vm666_vm5 = vcmask (!%p252_p9), 1043459   ;;  %vm668_vm6 = vcmask (!%p252_p9), 1044484  }
  0x13   : > { %v1424_v32 = vsub.s32 (!%p252_p9), 0, %v1417_v22  ;;  %vm670_vm7 = vcmask (!%p252_p9), 1045509   ;;  %vm672_vm8 = vcmask (!%p252_p9), 1046534   ;;  %vm674_vm9 = vcmask (!%p252_p9), 1047559  }
  0x14   : > { %v469_v21 = vunpack.c.0.s8 (!%p252_p9), %v468_v19  ;;  %vm677_vm10 = vcmask (!%p252_p9), 64512  }
  0x15   : > { %1113 = vmatpush3.bf16.msra.mxu0 (!%p252_p9), %v1175_v3 }
  0x16   : > { %v472_v24 = vsub.s32 (!%p252_p9), %v469_v21, %v1417_v22 }
  0x17   : > { %s294_s21 = scalar_select %p293_p10, %s1343_s6, 1 }
  0x18   : > { %s1608_s20 = smov (!%p288_p11, %s1085_s20), 15 }
  0x19   : > { %s1087_s22 = sshll.u32 %s294_s21, 3  ;;  %s1086_s30 = sshll.u32 %s1608_s20, 3 }
  0x1a   : > { %s296_s25 = scalar_lea.vmem %s1594_s1, %s1087_s22  ;;  %s291_s14 = scalar_lea.vmem %s1593_s0, %s1086_s30 }
  0x1b   : > { %v404_v4 = vld [vmem:[%s296_s25] sm:$0xff]  ;;  %v1390_v7 = vld [vmem:[%s291_s14 + $0x8] sm:$0xff]  ;;  %v1392_v8 = vld [vmem:[%s291_s14 + $0x10] sm:$0xff]  ;;  %s284_s20 = sand.u32 1, %s1264_s27   ;;  %s1099_s22 = sshll.u32 %s1343_s6, 7 }
  0x1c   : > { %v405_v5 = vpack.c.bf16 %v404_v4, %v404_v4  ;;  %v1388_v6 = vld [vmem:[%s291_s14] sm:$0xff]  ;;  %v1396_v10 = vld [vmem:[%s291_s14 + $0x18] sm:$0xff]  ;;  %v1400_v12 = vld [vmem:[%s291_s14 + $0x28] sm:$0xff]  ;;  %s1084_s21 = sshll.u32 %s284_s20, 3  ;;  %s1547_s9 = scalar_lea.hbm %s1600_s7, %s1099_s22 }
  0x1d   : > { %v306_v9 = vpack.c.bf16 %v1390_v7, %v1388_v6  ;;  %v1398_v11 = vld [vmem:[%s291_s14 + $0x20] sm:$0xff]  ;;  %v307_v13 = vpack.c.bf16 %v1396_v10, %v1392_v8  ;;  %v1409_v15 = vld [vmem:[%s291_s14 + $0x30] sm:$0xff]  ;;  %v1411_v16 = vld [vmem:[%s291_s14 + $0x38] sm:$0xff]  ;;  %s286_s23 = scalar_lea.vmem [#allocation3], %s1084_s21  ;;  %s996_s6 = scalar_lea.sflag [#allocation4], %s284_s20 }
  0x1e   : > { %1125 = vmatmul.mubr.msk.bf16.vlgmr.msra.gmra.mrb[0].mxu1 %vm421_vm1, %v405_v5  ;;  %v308_v14 = vpack.c.bf16 %v1400_v12, %v1398_v11  ;;  %v309_v17 = vpack.c.bf16 %v1411_v16, %v1409_v15  ;;  %v1097_v4 = vld [vmem:[%s1598_s5] ss:$0 sm:$0xff]  ;;  %s1009_s24 = sshll.u32 %s286_s23, 4  ;;  %s1278_s14 = smov [#allocation3]   ;;  %s1549_s24 = int_to_ptr.vmem [resolvable:$true] %s1009_s24 }
  0x1f   : > { %1114 = vmatprep.mubr.msk.bf16.mxu0 %vm326_vm2, %v306_v9  ;;  %s1210_s10 = scalar_lea.vmem %s1549_s24, 128  ;;  %s1214_s15 = sshll.u32 %s1278_s14, 4  ;;  %s1215_s15 = int_to_ptr.vmem [resolvable:$false] %s1214_s15 }
  0x20   : > { %1115 = vmatmul.mubr.msk.bf16.vlgmr.msra.gmra.mrb[0].mxu0 %vm326_vm2, %v307_v13  ;;  %p1211_p12 = scmp.ne.s32.totalorder %s1549_s24, %s1210_s10  ;;  %s1216_s16 = scalar_lea.vmem %s1215_s15, 256 }
  0x21   : > { %1118 = vmatprep.mubr.msk.bf16.mxu0 %vm326_vm2, %v308_v14  ;;  %p1217_p1 = scmp.lt.s32.totalorder %s1549_s24, %s1215_s15  ;;  %p1218_p2 = scmp.lt.s32.totalorder %s1216_s16, %s1210_s10 }
  0x22   : > { %p1212_p13 = pnand %p1211_p12, %p1360_p5 }
  0x23   : > { %p1219_p3 = por %p1218_p2, %p1217_p1 }
  0x24   : > { %p1213_p0 = pneg %p1212_p13 }
  0x26   : > { %p1220_p4 = pnand %p1219_p3, %p1213_p0 }
  0x28   : > { %1119 = vmatmul.mubr.msk.bf16.gmra.mrb[4].mxu0 %vm326_vm2, %v309_v17 }
  0xf1   : > { %v459_v25 = vpop.f32.mrb[0].mxu1 }
  0xf2   : > { %v460_v26 = vadd.f32 %v1094_v23, %v459_v25  ;;  %v1126_v27 = vpop.f32.mrb[1].mxu1 }
  0xf3   : > { %v462_v28 = vpop.f32.mrb[2].mxu1  ;;  %v1116_v36 = vpop.f32.mrb[0].mxu0 }
  0xf4   : > { %v466_v29 = vcombine.high %v460_v26, %v460_v26  ;;  %v473_v30 = vrot.slane %v460_v26, %v472_v24  ;;  %v1127_v31 = vpop.f32.mrb[3].mxu1  ;;  %v373_v37 = vpop.f32.mrb[1].mxu0 }
  0xf5   : > { %v1117_v41 = vpop.f32.mrb[2].mxu0 }
  0xf6   : > { %v480_v33 = vrot.slane %v466_v29, %v472_v24  ;;  %v481_v34 = vcombine.high %v473_v30, %v473_v30  ;;  %v489_v35 = vrot.slane %v473_v30, %v472_v24  ;;  %v376_v43 = vpop.f32.mrb[3].mxu0 }
  0xf8   : > { %v482_v38 = vcombine.high %v480_v33, %v480_v33  ;;  %v511_v39 = vcombine.high %v489_v35, %v489_v35  ;;  %v518_v40 = vrot.slane %v489_v35, %v1424_v32  ;;  %v503_v42 = vrot.slane %v481_v34, %v472_v24 }
  0xf9   : > { %v496_v44 = vrot.slane %v480_v33, %v472_v24 }
  0xfa   : > { %v526_v45 = vrot.slane %v511_v39, %v1424_v32  ;;  %v555_v46 = vadd.f32 %v518_v40, %v373_v37  ;;  %v513_v47 = vcombine.high %v503_v42, %v503_v42  ;;  %v522_v48 = vrot.slane %v503_v42, %v1424_v32 }
  0xfb   : > { %v512_v49 = vcombine.high %v496_v44, %v496_v44  ;;  %v534_v50 = vrot.slane %v496_v44, %v1424_v32  ;;  %v510_v51 = vrot.slane %v482_v38, %v472_v24  ;;  %v1120_v58 = vpop.f32.mrb[4].mxu0  ;;  %v629_v40 = vand.u32 127, %v470_v20 }
  0xfc   : > { %v557_v52 = vadd.f32 %v1116_v36, %v526_v45  ;;  %1176 = vtanh.f32 %v555_v46  ;;  %v530_v53 = vrot.slane %v513_v47, %v1424_v32  ;;  %v556_v54 = vadd.f32 %v522_v48, %v376_v43  ;;  %v389_v61 = vpop.f32.mrb[5].mxu0 }
  0xfd   : > { %v542_v55 = vrot.slane %v512_v49, %v1424_v32  ;;  %v514_v56 = vcombine.high %v510_v51, %v510_v51  ;;  %v538_v59 = vrot.slane %v510_v51, %v1424_v32  ;;  %v559_v63 = vadd.f32 %v534_v50, %v389_v61  ;;  %v1121_v0 = vpop.f32.mrb[6].mxu0 }
  0xfe   : > { %1178 = vtanh.f32 %v557_v52  ;;  %v558_v57 = vadd.f32 %v1117_v41, %v530_v53  ;;  %v392_v2 = vpop.f32.mrb[7].mxu0  ;;  %v611_v41 = vstv %s610_s19  ;;  %v1447_v44 = vsub.s32 %v629_v40, %v1417_v22 }
  0xff   : > { %1180 = vtanh.f32 %v556_v54  ;;  %v561_v60 = vadd.f32 %v1120_v58, %v542_v55  ;;  %v546_v62 = vrot.slane %v514_v56, %v1424_v32  ;;  %v560_v3 = vadd.f32 %v538_v59, %v392_v2 }
 0x100   : > { %1182 = vtanh.f32 %v558_v57  ;;  %v708_v40 = vsub.s32 6, %v1417_v22 }
 0x101   : > { %v562_v1 = vadd.f32 %v1121_v0, %v546_v62  ;;  %1184 = vtanh.f32 %v559_v63 }
 0x102   : > { %1186 = vtanh.f32 %v561_v60 }
 0x103   : > { %1188 = vtanh.f32 %v560_v3 }
 0x104   : > { %1190 = vtanh.f32 %v562_v1 }
 0x106   : > { %v1177_v5 = vpop.eup %1176 }
 0x107   : > { %v578_v9 = vmul.f32 %v1177_v5, %v1097_v4 }
 0x108   : > { %v1179_v13 = vpop.eup %1178 }
 0x109   : > { %v1181_v14 = vpop.eup %1180  ;;  %v586_v17 = vsel %vm326_vm2, %v578_v9, 0.0  ;;  %v580_v18 = vmul.f32 %v1179_v13, %v1097_v4 }
 0x10a   : > { %v1183_v19 = vpop.eup %1182  ;;  %587 = vadd.xlane.f32.xlu0 %v586_v17  ;;  %v579_v21 = vmul.f32 %v1181_v14, %v1097_v4 }
 0x10b   : > { %v592_v23 = vsel %vm326_vm2, %v580_v18, 0.0  ;;  %v581_v24 = vmul.f32 %v1183_v19, %v1097_v4  ;;  %v1185_v25 = vpop.eup %1184  ;;  %v1277_v18 = vmov 0   ;;  %v688_v19 = vsub.s32 1, %v1417_v22 }
 0x10c   : > { %593 = vadd.xlane.f32.xlu1 %v592_v23  ;;  %v1187_v26 = vpop.eup %1186  ;;  %v589_v27 = vsel %vm326_vm2, %v579_v21, 0.0  ;;  %v582_v28 = vmul.f32 %v1185_v25, %v1097_v4  ;;  %1172 = vset.pattern.permute.xlu0 %v1277_v18  ;;  %v692_v21 = vsub.s32 2, %v1417_v22  ;;  %v696_v23 = vsub.s32 3, %v1417_v22 }
 0x10d   : > { %v1189_v29 = vpop.eup %1188  ;;  %v595_v30 = vsel %vm326_vm2, %v581_v24, 0.0  ;;  %v584_v35 = vmul.f32 %v1187_v26, %v1097_v4  ;;  %1171 = vset.pattern.permute.xlu1 %v1277_v18 }
 0x10e   : > { %590 = vadd.xlane.f32.xlu0 %v589_v27  ;;  %v583_v31 = vmul.f32 %v1189_v29, %v1097_v4  ;;  %v1191_v33 = vpop.eup %1190  ;;  %v598_v34 = vsel %vm326_vm2, %v582_v28, 0.0  ;;  %v700_v28 = vsub.s32 4, %v1417_v22 }
 0x10f   : > { %v585_v37 = vmul.f32 %v1191_v33, %v1097_v4  ;;  %v604_v38 = vsel %vm326_vm2, %v584_v35, 0.0 }
 0x110   : > { %596 = vadd.xlane.f32.xlu1 %v595_v30  ;;  %v601_v36 = vsel %vm326_vm2, %v583_v31, 0.0 }
 0x111   : > { %v607_v39 = vsel %vm326_vm2, %v585_v37, 0.0 }
 0x112   : > { %599 = vadd.xlane.f32.xlu0 %v598_v34 }
 0x114   : > { %602 = vadd.xlane.f32.xlu1 %v601_v36  ;;  %v704_v36 = vsub.s32 5, %v1417_v22 }
 0x116   : > { %605 = vadd.xlane.f32.xlu0 %v604_v38 }
 0x118   : > { %608 = vadd.xlane.f32.xlu1 %v607_v39 }
 0x197   : > { %v588_v42 = vpop.xlane.xlu0 %587 }
 0x198   : > { %v612_v45 = vadd.f32 %v611_v41, %v588_v42 }
 0x199   : > { %v594_v43 = vpop.xlane.xlu1 %593 }
 0x19a   : > { %v614_v46 = vadd.f32 %v611_v41, %v594_v43  ;;  %v633_v50 = vrot.slane %v612_v45, %v1447_v44 }
 0x19b   : > { %v591_v47 = vpop.xlane.xlu0 %590 }
 0x19c   : > { %v613_v48 = vadd.f32 %v611_v41, %v591_v47  ;;  %v641_v20 = vrot.slane %v614_v46, %v1447_v44 }
 0x19d   : > { %v597_v49 = vpop.xlane.xlu1 %596 }
 0x19e   : > { %v637_v51 = vrot.slane %v613_v48, %v1447_v44  ;;  %v615_v52 = vadd.f32 %v611_v41, %v597_v49 }
 0x19f   : > { %v600_v53 = vpop.xlane.xlu0 %599 }
 0x1a0   : > { %v663_v54 = vsel %vm662_vm3, %v637_v51, %v633_v50  ;;  %v645_v55 = vrot.slane %v615_v52, %v1447_v44  ;;  %v616_v56 = vadd.f32 %v611_v41, %v600_v53 }
 0x1a1   : > { %v665_v57 = vsel %vm664_vm4, %v641_v20, %v663_v54  ;;  %v603_v58 = vpop.xlane.xlu1 %602 }
 0x1a2   : > { %v667_v59 = vsel %vm666_vm5, %v645_v55, %v665_v57  ;;  %v649_v60 = vrot.slane %v616_v56, %v1447_v44  ;;  %v617_v61 = vadd.f32 %v611_v41, %v603_v58 }
 0x1a3   : > { %v606_v62 = vpop.xlane.xlu0 %605 }
 0x1a4   : > { %v669_v63 = vsel %vm668_vm6, %v649_v60, %v667_v59  ;;  %v653_v0 = vrot.slane %v617_v61, %v1447_v44  ;;  %v618_v1 = vadd.f32 %v611_v41, %v606_v62 }
 0x1a5   : > { %v609_v2 = vpop.xlane.xlu1 %608 }
 0x1a6   : > { %v657_v3 = vrot.slane %v618_v1, %v1447_v44  ;;  %v619_v4 = vadd.f32 %v611_v41, %v609_v2  ;;  %v671_v5 = vsel %vm670_vm7, %v653_v0, %v669_v63 }
 0x1a8   : > { %v661_v9 = vrot.slane %v619_v4, %v1447_v44  ;;  %v673_v13 = vsel %vm672_vm8, %v657_v3, %v671_v5 }
 0x1aa   : > { %v675_v14 = vsel %vm674_vm9, %v661_v9, %v673_v13 }
 0x1ab   : > { %v678_v17 = vsel %vm677_vm10, %v675_v14, -inf }
 0x1ac   : > { %679 = vmax.xlane.f32.xlu0 %v678_v17 }
 0x239   : > { %v680_v24 = vpop.xlane.xlu0 %679 }
 0x23a   : > { %v685_v25 = vrot.slane %v680_v24, %v1424_v32  ;;  %v689_v26 = vrot.slane %v680_v24, %v688_v19  ;;  %v693_v27 = vrot.slane %v680_v24, %v692_v21  ;;  %v697_v29 = vrot.slane %v680_v24, %v696_v23 }
 0x23b   : > { %v701_v37 = vrot.slane %v680_v24, %v700_v28  ;;  %v705_v41 = vrot.slane %v680_v24, %v704_v36 }
 0x23c   : > { %v722_v30 = vsub.f32 %v612_v45, %v685_v25  ;;  %v723_v31 = vsub.f32 %v613_v48, %v689_v26  ;;  %v724_v33 = vsub.f32 %v614_v46, %v693_v27  ;;  %v725_v38 = vsub.f32 %v615_v52, %v697_v29 }
 0x23d   : > { %v726_v42 = vsub.f32 %v616_v56, %v701_v37  ;;  %v712_v45 = vsub.s32 7, %v1417_v22  ;;  %v709_v46 = vrot.slane %v680_v24, %v708_v40  ;;  %v727_v47 = vsub.f32 %v617_v61, %v705_v41 }
 0x23e   : > { %v730_v34 = vmul.f32 1.442695, %v722_v30  ;;  %v732_v35 = vmul.f32 1.442695, %v723_v31  ;;  %v734_v39 = vmul.f32 1.442695, %v724_v33 }
 0x23f   : > { %v736_v43 = vmul.f32 1.442695, %v725_v38  ;;  %v738_v48 = vmul.f32 1.442695, %v726_v42  ;;  %v713_v51 = vrot.slane %v680_v24, %v712_v45  ;;  %v728_v52 = vsub.f32 %v618_v1, %v709_v46 }
 0x240   : > { %1192 = vpow2.f32 %v730_v34  ;;  %v740_v20 = vmul.f32 1.442695, %v727_v47 }
 0x241   : > { %1194 = vpow2.f32 %v732_v35  ;;  %v729_v54 = vsub.f32 %v619_v4, %v713_v51  ;;  %v742_v55 = vmul.f32 1.442695, %v728_v52 }
 0x242   : > { %1196 = vpow2.f32 %v734_v39 }
 0x243   : > { %1198 = vpow2.f32 %v736_v43  ;;  %v744_v57 = vmul.f32 1.442695, %v729_v54 }
 0x244   : > { %1200 = vpow2.f32 %v738_v48 }
 0x245   : > { %1202 = vpow2.f32 %v740_v20 }
 0x246   : > { %1204 = vpow2.f32 %v742_v55 }
 0x247   : > { %1206 = vpow2.f32 %v744_v57 }
 0x24a   : > { %v1193_v49 = vpop.eup %1192 }
 0x24b   : > { %v1195_v50 = vpop.eup %1194  ;;  %755 = vperm.xlu1 %1171, %v1193_v49  }
 0x24c   : > { %758 = vperm.xlu0 %1172, %v1195_v50   ;;  %v1197_v53 = vpop.eup %1196 }
 0x24d   : > { %v1199_v56 = vpop.eup %1198 }
 0x24e   : > { %v1201_v58 = vpop.eup %1200 }
 0x24f   : > { %761 = vperm.xlu1 %1171, %v1197_v53   ;;  %v1203_v59 = vpop.eup %1202 }
 0x250   : > { %v1205_v60 = vpop.eup %1204 }
 0x251   : > { %v1207_v61 = vpop.eup %1206 }
 0x253   : > { %764 = vperm.xlu1 %1171, %v1199_v56  }
 0x257   : > { %767 = vperm.xlu1 %1171, %v1201_v58  }
 0x25b   : > { %770 = vperm.xlu1 %1171, %v1203_v59  }
 0x25f   : > { %773 = vperm.xlu1 %1171, %v1205_v60  }
 0x263   : > { %776 = vperm.xlu1 %1171, %v1207_v61  }
 0x2ca   : > { %v756_v62 = vpop.permute.xlu1 %755 }
 0x2cb   : > { %v759_v2 = vpop.permute.xlu0 %758  ;;  %v781_v5 = vrot.slane %v756_v62, %v1447_v44 }
 0x2cc   : > { %v785_v4 = vrot.slane %v759_v2, %v1447_v44 }
 0x2ce   : > { %v762_v63 = vpop.permute.xlu1 %761  ;;  %v810_v18 = vsel %vm662_vm3, %v785_v4, %v781_v5 }
 0x2cf   : > { %v789_v9 = vrot.slane %v762_v63, %v1447_v44 }
 0x2d1   : > { %v811_v25 = vsel %vm664_vm4, %v789_v9, %v810_v18 }
 0x2d2   : > { %v765_v0 = vpop.permute.xlu1 %764 }
 0x2d3   : > { %v793_v13 = vrot.slane %v765_v0, %v1447_v44 }
 0x2d5   : > { %v812_v27 = vsel %vm666_vm5, %v793_v13, %v811_v25 }
 0x2d6   : > { %v768_v1 = vpop.permute.xlu1 %767 }
 0x2d7   : > { %v797_v14 = vrot.slane %v768_v1, %v1447_v44 }
 0x2d9   : > { %v813_v29 = vsel %vm668_vm6, %v797_v14, %v812_v27 }
 0x2da   : > { %v771_v3 = vpop.permute.xlu1 %770 }
 0x2db   : > { %v801_v24 = vrot.slane %v771_v3, %v1447_v44 }
 0x2dd   : > { %v814_v31 = vsel %vm670_vm7, %v801_v24, %v813_v29 }
 0x2de   : > { %v774_v17 = vpop.permute.xlu1 %773 }
 0x2df   : > { %v805_v26 = vrot.slane %v774_v17, %v1447_v44 }
 0x2e1   : > { %v815_v34 = vsel %vm672_vm8, %v805_v26, %v814_v31 }
 0x2e2   : > { %v777_v30 = vpop.permute.xlu1 %776 }
 0x2e3   : > { %v809_v33 = vrot.slane %v777_v30, %v1447_v44 }
 0x2e5   : > { %v816_v35 = vsel %vm674_vm9, %v809_v33, %v815_v34 }
 0x2e6   : > { %v818_v37 = vsel %vm677_vm10, %v816_v35, 0.0 }
 0x2e7   : > { %819 = vadd.xlane.f32.xlu1 %v818_v37 }
 0x374   : > { %v820_v38 = vpop.xlane.xlu1 %819 }
 0x375   : > { %1208 = vrcp.f32 %v820_v38 }
 0x37f   : > { %v1209_v39 = vpop.eup %1208 }
 0x380   : > { %v822_v41 = vmul.f32 %v1209_v39, %v820_v38 }
 0x382   : > { %v823_v42 = vsub.f32 2.0, %v822_v41 }
 0x384   : > { %v824_v43 = vmul.f32 %v1209_v39, %v823_v42 }
 0x386   : > { %v829_v46 = vrot.slane %v824_v43, %v1424_v32  ;;  %v833_v48 = vrot.slane %v824_v43, %v688_v19  ;;  %v837_v51 = vrot.slane %v824_v43, %v692_v21  ;;  %v841_v20 = vrot.slane %v824_v43, %v696_v23 }
 0x387   : > { %v845_v55 = vrot.slane %v824_v43, %v700_v28  ;;  %v849_v19 = vrot.slane %v824_v43, %v704_v36  ;;  %v853_v21 = vrot.slane %v824_v43, %v708_v40  ;;  %v857_v23 = vrot.slane %v824_v43, %v712_v45 }
 0x388   : > { %v866_v47 = vmul.f32 %v1193_v49, %v829_v46  ;;  %v867_v44 = vmul.f32 %v1195_v50, %v833_v48  ;;  %v868_v52 = vmul.f32 %v1197_v53, %v837_v51  ;;  %v869_v54 = vmul.f32 %v1199_v56, %v841_v20 }
 0x389   : > { %v870_v32 = vmul.f32 %v1201_v58, %v845_v55  ;;  %v871_v49 = vmul.f32 %v1203_v59, %v849_v19  ;;  %v872_v50 = vmul.f32 %v1205_v60, %v853_v21  ;;  %v873_v53 = vmul.f32 %v1207_v61, %v857_v23 }
 0x38a   : > { %876 = vperm.xlu0 %1172, %v866_v47  }
 0x38e   : > { %881 = vperm.xlu0 %1172, %v867_v44  }
 0x392   : > { %886 = vperm.xlu0 %1172, %v868_v52  }
 0x396   : > { %891 = vperm.xlu0 %1172, %v869_v54  }
 0x39a   : > { %896 = vperm.xlu0 %1172, %v870_v32  }
 0x39e   : > { %901 = vperm.xlu0 %1172, %v871_v49  }
 0x3a2   : > { %906 = vperm.xlu0 %1172, %v872_v50  }
 0x3a6   : > { %911 = vperm.xlu0 %1172, %v873_v53  }
 0x409   : > { %v877_v56 = vpop.permute.xlu0 %876 }
 0x40a   : > { %v914_v36 = vmul.f32 %v877_v56, %v1388_v6 }
 0x40c   : > { %v922_v22 = vsel %vm326_vm2, %v914_v36, 0.0 }
 0x40d   : > { %v882_v28 = vpop.permute.xlu0 %881  ;;  %v923_v1 = vrot.slane %v922_v22, 4 }
 0x40e   : > { %v915_v57 = vmul.f32 %v882_v28, %v1390_v7 }
 0x40f   : > { %v924_v5 = vadd.f32 %v923_v1, %v922_v22 }
 0x410   : > { %v929_v62 = vsel %vm326_vm2, %v915_v57, 0.0 }
 0x411   : > { %v887_v58 = vpop.permute.xlu0 %886  ;;  %v930_v61 = vrot.slane %v929_v62, 4  ;;  %v925_v26 = vrot.slane %v924_v5, 2 }
 0x412   : > { %v916_v59 = vmul.f32 %v887_v58, %v1392_v8 }
 0x413   : > { %v931_v3 = vadd.f32 %v930_v61, %v929_v62  ;;  %v926_v38 = vadd.f32 %v925_v26, %v924_v5 }
 0x414   : > { %v936_v40 = vsel %vm326_vm2, %v916_v59, 0.0 }
 0x415   : > { %v892_v60 = vpop.permute.xlu0 %891  ;;  %v937_v63 = vrot.slane %v936_v40, 4  ;;  %v927_v52 = vrot.slane %v926_v38, 1 }
 0x416   : > { %v917_v45 = vmul.f32 %v892_v60, %v1396_v10  ;;  %v932_v10 = vrot.slane %v931_v3, 2 }
 0x417   : > { %v938_v8 = vadd.f32 %v937_v63, %v936_v40  ;;  %v928_v23 = vadd.f32 %v927_v52, %v926_v38 }
 0x418   : > { %v943_v0 = vsel %vm326_vm2, %v917_v45, 0.0  ;;  %v933_v33 = vadd.f32 %v932_v10, %v931_v3 }
 0x419   : > { %v944_v7 = vrot.slane %v943_v0, 4  ;;  %v897_v2 = vpop.permute.xlu0 %896  ;;  %v939_v24 = vrot.slane %v938_v8, 2 }
 0x41a   : > { %v918_v6 = vmul.f32 %v897_v2, %v1398_v11  ;;  %v934_v47 = vrot.slane %v933_v33, 1 }
 0x41b   : > { %v945_v9 = vadd.f32 %v944_v7, %v943_v0  ;;  %v940_v35 = vadd.f32 %v939_v24, %v938_v8 }
 0x41c   : > { %v950_v4 = vsel %vm326_vm2, %v918_v6, 0.0  ;;  %v935_v19 = vadd.f32 %v934_v47, %v933_v33 }
 0x41d   : > { %v951_v13 = vrot.slane %v950_v4, 4  ;;  %v902_v14 = vpop.permute.xlu0 %901  ;;  %v946_v27 = vrot.slane %v945_v9, 2  ;;  %v941_v51 = vrot.slane %v940_v35, 1 }
 0x41e   : > { %v919_v17 = vmul.f32 %v902_v14, %v1400_v12  ;;  %v986_v58 = vsel %vm662_vm3, %v935_v19, %v928_v23 }
 0x41f   : > { %v952_v18 = vadd.f32 %v951_v13, %v950_v4  ;;  %v947_v12 = vadd.f32 %v946_v27, %v945_v9 }
 0x420   : > { %v957_v25 = vsel %vm326_vm2, %v919_v17, 0.0 }
 0x421   : > { %v958_v29 = vrot.slane %v957_v25, 4  ;;  %v907_v30 = vpop.permute.xlu0 %906  ;;  %v953_v11 = vrot.slane %v952_v18, 2  ;;  %v948_v20 = vrot.slane %v947_v12, 1 }
 0x422   : > { %v920_v31 = vmul.f32 %v907_v30, %v1409_v15 }
 0x423   : > { %v959_v34 = vadd.f32 %v958_v29, %v957_v25  ;;  %v954_v43 = vadd.f32 %v953_v11, %v952_v18  ;;  %v949_v53 = vadd.f32 %v948_v20, %v947_v12 }
 0x424   : > { %v964_v37 = vsel %vm326_vm2, %v920_v31, 0.0 }
 0x425   : > { %v960_v39 = vrot.slane %v959_v34, 2  ;;  %v965_v41 = vrot.slane %v964_v37, 4  ;;  %v912_v42 = vpop.permute.xlu0 %911  ;;  %v955_v32 = vrot.slane %v954_v43, 1 }
 0x426   : > { %v921_v46 = vmul.f32 %v912_v42, %v1411_v16  ;;  %v942_v16 = vadd.f32 %v941_v51, %v940_v35 }
 0x427   : > { %v961_v48 = vadd.f32 %v960_v39, %v959_v34  ;;  %v966_v44 = vadd.f32 %v965_v41, %v964_v37  ;;  %v956_v57 = vadd.f32 %v955_v32, %v954_v43 }
 0x428   : > { %v971_v15 = vsel %vm326_vm2, %v921_v46, 0.0  ;;  %v987_v62 = vsel %vm664_vm4, %v942_v16, %v986_v58 }
 0x429   : > { %v967_v54 = vrot.slane %v966_v44, 2  ;;  %v972_v55 = vrot.slane %v971_v15, 4  ;;  %v962_v49 = vrot.slane %v961_v48, 1  ;;  %v988_v60 = vsel %vm666_vm5, %v949_v53, %v987_v62 }
 0x42a   : > { %v989_v45 = vsel %vm668_vm6, %v956_v57, %v988_v60 }
 0x42b   : > { %v968_v21 = vadd.f32 %v967_v54, %v966_v44  ;;  %v973_v50 = vadd.f32 %v972_v55, %v971_v15  ;;  %v963_v36 = vadd.f32 %v962_v49, %v961_v48 }
 0x42d   : > { %v969_v56 = vrot.slane %v968_v21, 1  ;;  %v974_v28 = vrot.slane %v973_v50, 2  ;;  %v990_v63 = vsel %vm670_vm7, %v963_v36, %v989_v45 }
 0x42f   : > { %v975_v59 = vadd.f32 %v974_v28, %v973_v50  ;;  %v970_v40 = vadd.f32 %v969_v56, %v968_v21 }
 0x431   : > { %v976_v22 = vrot.slane %v975_v59, 1  ;;  %v991_v0 = vsel %vm672_vm8, %v970_v40, %v990_v63 }
 0x433   : > { %v977_v61 = vadd.f32 %v976_v22, %v975_v59 }
 0x435   : > { %v992_v1 = vsel %vm674_vm9, %v977_v61, %v991_v0 }
 0x436   : > { %994 = vst.msk [vmem:[%s286_s23] sm:$0xff] %vm326_vm2, %v992_v1 }
 0x437   : > { %1223 = shalt.err (!%p1220_p4)
}
 0x438   : > { %s1224_s17 = scalar_lea.hbm %s1547_s9, 128  ;;  %s1228_s20 = scalar_lea.hbm %s1600_s7, 256 }
 0x439   : > { %p1225_p7 = scmp.ne.s32.totalorder %s1547_s9, %s1224_s17  ;;  %p1229_p10 = scmp.lt.u32.totalorder %s1547_s9, %s1600_s7 }
 0x43a   : > { %p1230_p11 = scmp.lt.u32.totalorder %s1228_s20, %s1224_s17  ;;  %p1232_p13 = scmp.lt.u32.totalorder %s1224_s17, %s1547_s9 }
 0x43b   : > { %p1226_p8 = pnand %p1225_p7, %p1360_p5 }
 0x43c   : > { %p1231_p12 = por %p1230_p11, %p1229_p10 }
 0x43d   : > { %p1227_p9 = pneg %p1226_p8 }
 0x43e   : > { %p1233_p0 = por %p1232_p13, %p1231_p12 }
 0x440   : > { %p1234_p1 = pnand %p1233_p0, %p1227_p9 }
 0x442   : > { %1237 = shalt.err (!%p1234_p1)
}
 0x443   : > { %1128 = dma.vmem_to_hbm [thread:$0]  (%p1360_p5), %s1549_s24, 128, %s1547_s9, %s996_s6  }
 0x444 PF: > { %p1134_p2 = scmp.ge.s32.totalorder %s1272_s29, 2  ;;  %s1021_s23 = sand.u32 1, %s1260_s26  }
 0x445   : > { %s1022_s25 = scalar_lea.sflag [#allocation4], %s1021_s23 }
 0x446   : > { %p1131_p3 = pnand %p1134_p2, %p1364_p6 }
 0x448   : > { %1255 = dma.done.wait (!%p1131_p3), %s1022_s25, 128  }
 0x449   : > { %1257 = vsyncadd (!%p1131_p3), %s1022_s25, 4294967168  ;;  %p18_p4 = scmp.ge.s32.totalorder %s1347_s8, 4   ;;  %s1603_s26 = smov %s1264_s27 }
 0x44a   : > { %s1604_s27 = smov %s1268_s28  ;;  %s1605_s28 = smov %s1358_s11 }
 0x44b   : > { %s1606_s29 = smov %s1347_s8  ;;  %20 = sbr.rel (!%p18_p4) target bundleno = 5 (0x5), region = 86 }
 0x452   :  { %1027 = vsyncpa [#allocation4], 1 }
 0x453   :  { %1029 = vsyncpa [#allocation4 + $0x1], 1 }

</bundles_post_ra>
